<compile_context>
chip_gen: v5e
topology: v5e:2x2
jax: 0.10.0
libtpu: 0.0.40
codegen_flags: <defaults>
</compile_context>

<pallas_src>
import jax
import jax.numpy as jnp
from jax import lax
from jax.experimental import pallas as pl
from jax.experimental.pallas import tpu as pltpu

VOCAB = 29
MAX_LEN = 12
NUM_HIDDENS = 256


def _make_ebd_kernel(B: int, T: int):
    """Build the kernel with static batch/sequence sizes baked in."""

    def ebd_kernel(tok_ref, wtab_ref, ptab_ref, out_ref):
        # tok_ref : (B*T, 1) int32 token ids            (VMEM)
        # wtab_ref: (VOCAB, D) f32 word-embedding table (VMEM)
        # ptab_ref: (MAX_LEN, D) f32 positional table   (VMEM)
        # out_ref : (B*T, D) f32                        (VMEM)
        bt = B * T
        v = wtab_ref.shape[0]

        # Word-embedding gather as a one-hot MXU matmul: (B*T, V) @ (V, D).
        iota_v = lax.broadcasted_iota(jnp.int32, (bt, v), 1)
        onehot = (tok_ref[...] == iota_v).astype(jnp.float32)
        word = jnp.dot(onehot, wtab_ref[...], preferred_element_type=jnp.float32)

        # Positional rows (static slice of the raw table) broadcast over the
        # batch inside the kernel — no HBM-materialized (B*T, D) slab.
        pos = ptab_ref[:T, :]                     # (T, D), static slice
        for b in range(B):                        # static unroll: B aligned stores
            out_ref[pl.ds(b * T, T), :] = (
                word[b * T:(b + 1) * T, :] + pos
            ).astype(out_ref.dtype)

    return ebd_kernel


def ebd_forward(word_tab, pos_tab, x_tokens):
    """word_tab: (VOCAB, D) f32; pos_tab: (MAX_LEN, D) f32; x_tokens: (B, T) int."""
    B, T = x_tokens.shape
    D = word_tab.shape[1]

    tok2d = x_tokens.reshape(B * T, 1).astype(jnp.int32)

    vmem = pl.BlockSpec(memory_space=pltpu.MemorySpace.VMEM)
    out_flat = pl.pallas_call(
        _make_ebd_kernel(B, T),
        out_shape=jax.ShapeDtypeStruct((B * T, D), word_tab.dtype),
        in_specs=[vmem, vmem, vmem],
        out_specs=vmem,
    )(tok2d, word_tab, pos_tab)

    return out_flat.reshape(B, T, D)


if __name__ == "__main__":
    key = jax.random.PRNGKey(0)
    k_w, k_p, k_x = jax.random.split(key, 3)

    B, T = 2, 8                        # T <= 12 (positional-table length)
    word_tab = jax.random.normal(k_w, (VOCAB, NUM_HIDDENS), jnp.float32) * 0.02
    pos_tab = jax.random.normal(k_p, (MAX_LEN, NUM_HIDDENS), jnp.float32) * 0.02
    X = jax.random.randint(k_x, (B, T), 0, VOCAB, dtype=jnp.int32)

    out = jax.jit(ebd_forward)(word_tab, pos_tab, X)
    out = jax.block_until_ready(out)

    # Reference (plain JAX) check of the module semantics.
    ref = word_tab[X] + pos_tab[:T][None, :, :]
    assert out.shape == (B, T, NUM_HIDDENS), out.shape
    assert bool(jnp.all(jnp.isfinite(out)))
    assert bool(jnp.allclose(out, ref, atol=1e-6, rtol=1e-6))
    print("KERNEL_OK")
</pallas_src>

<mosaic_0001>
module attributes {stable_mosaic.version = 11 : i64} {
  func.func @ebd_kernel(%arg0: memref<16x1xi32, #tpu.memory_space<vmem>>, %arg1: memref<29x256xf32, #tpu.memory_space<vmem>>, %arg2: memref<12x256xf32, #tpu.memory_space<vmem>>, %arg3: memref<16x256xf32, #tpu.memory_space<vmem>>) attributes {dimension_semantics = [], scalar_prefetch = 0 : i64, scratch_operands = 0 : i64, tpu.core_type = #tpu.core_type<tc>} {
    %0 = tpu.iota {dimensions = array<i32: 1>} : vector<16x29xi32>
    %c0 = arith.constant 0 : index
    %c0_0 = arith.constant 0 : index
    %1 = vector.load %arg0[%c0, %c0_0] : memref<16x1xi32, #tpu.memory_space<vmem>>, vector<16x1xi32>
    %2 = vector.broadcast %1 : vector<16x1xi32> to vector<16x29xi32>
    %3 = arith.cmpi eq, %2, %0 : vector<16x29xi32>
    %4 = arith.extui %3 : vector<16x29xi1> to vector<16x29xi32>
    %5 = arith.sitofp %4 : vector<16x29xi32> to vector<16x29xf32>
    %c0_1 = arith.constant 0 : index
    %c0_2 = arith.constant 0 : index
    %6 = vector.load %arg1[%c0_1, %c0_2] : memref<29x256xf32, #tpu.memory_space<vmem>>, vector<29x256xf32>
    %cst = arith.constant dense<0.000000e+00> : vector<16x256xf32>
    %7 = tpu.matmul %5, %6, %cst {dimension_numbers = #tpu.dot_dimension_numbers<[1], [0], [0], [1], [0, 0, 1, 1], [], []>} : vector<16x29xf32>, vector<29x256xf32>, vector<16x256xf32> -> vector<16x256xf32>
    %c0_3 = arith.constant 0 : index
    %c0_4 = arith.constant 0 : index
    %8 = vector.load %arg2[%c0_3, %c0_4] : memref<12x256xf32, #tpu.memory_space<vmem>>, vector<8x256xf32>
    %9 = vector.extract_strided_slice %7 {offsets = [0, 0], sizes = [8, 256], strides = [1, 1]} : vector<16x256xf32> to vector<8x256xf32>
    %10 = arith.addf %9, %8 : vector<8x256xf32>
    %c0_5 = arith.constant 0 : index
    %c0_6 = arith.constant 0 : index
    %11 = vector.load %arg3[%c0_5, %c0_6] : memref<16x256xf32, #tpu.memory_space<vmem>>, vector<8x256xf32>
    tpu.vector_store %arg3[%c0_5, %c0_6], %10 {strides = array<i32>} : memref<16x256xf32, #tpu.memory_space<vmem>>, vector<8x256xf32>,
    %12 = vector.extract_strided_slice %7 {offsets = [8, 0], sizes = [8, 256], strides = [1, 1]} : vector<16x256xf32> to vector<8x256xf32>
    %13 = arith.addf %12, %8 : vector<8x256xf32>
    %c8 = arith.constant 8 : index
    %c0_7 = arith.constant 0 : index
    %14 = vector.load %arg3[%c8, %c0_7] : memref<16x256xf32, #tpu.memory_space<vmem>>, vector<8x256xf32>
    tpu.vector_store %arg3[%c8, %c0_7], %13 {strides = array<i32>} : memref<16x256xf32, #tpu.memory_space<vmem>>, vector<8x256xf32>,
    return
  }
}

</mosaic_0001>

<bundles_post_ra>
// kernel: ebd_forward.1
= control target key start
LH: loop header
LB: loop body
LE: loop exit
PB: predicated region body
PF: predicated region fallthrough
CT: control target
= control target key end

     0   :  { %8 = vsyncpa [#allocation3], 0  ;;  %s314_s0 = inlined_call_operand.vmem [shape: s32[16,1], index: 0, kind: input, shape index: {}]   ;;  %s315_s1 = inlined_call_operand.hbm [shape: f32[29,256], index: 1, kind: input, shape index: {}]   ;;  %s316_s2 = inlined_call_operand.hbm [shape: f32[12,256], index: 2, kind: input, shape index: {}]   ;;  %s317_s3 = inlined_call_operand.hbm [shape: f32[16,256], index: 3, kind: output, shape index: {}]  }
   0x1   :  { %9 = vsyncpa [#allocation6], 0 }
   0x2   :  { %10 = vsyncpa [#allocation4], 0  ;;  %s17_s14 = sshll.u32 %s315_s1, 4  ;;  %s263_s15 = smov [#allocation2]   ;;  %s18_s14 = int_to_ptr.hbm [resolvable:$true] %s17_s14 }
   0x3   :  { %s19_s16 = sshll.u32 %s263_s15, 4  ;;  %s30_s19 = sshll.u32 %s316_s2, 4  ;;  %s20_s16 = int_to_ptr.vmem [resolvable:$true] %s19_s16  ;;  %s31_s19 = int_to_ptr.hbm [resolvable:$true] %s30_s19 }
   0x4   :  { %s264_s20 = smov 256   ;;  %s265_s21 = smov 16  }
   0x5   :  { %25 = dma.hbm_to_vmem [thread:$0]  %s18_s14, 1024, %s20_s16, [#allocation3], %s264_s20, %s264_s20, %s265_s21  }
   0x6   :  { %s266_s22 = smov [#allocation5]  }
   0x7   :  { %s32_s23 = sshll.u32 %s266_s22, 4  ;;  %s33_s23 = int_to_ptr.vmem [resolvable:$true] %s32_s23 }
   0x8   :  { %38 = dma.hbm_to_vmem [thread:$0]  %s31_s19, 512, %s33_s23, [#allocation6], %s264_s20, %s264_s20, %s265_s21  }
   0x9   :  { %257 = dma.done.wait [#allocation3], 1024  }
   0xa   :  { %258 = vsyncadd [#allocation3], 4294966272 }
   0xb   :  { %259 = dma.done.wait [#allocation6], 512  }
   0xc   :  { %260 = vsyncadd [#allocation6], 4294966784  ;;  %v267_v0 = vmov 0   ;;  %vm78_vm0 = vcmask 1044480   ;;  %v50_v1 = vld [vmem:[%s314_s0 + $0x8] sm:$0xff]  ;;  %v67_v4 = vld [vmem:[#allocation2 + $0x20] sm:$0xff]  ;;  %v47_v11 = vlaneseq }
   0xd   :  { %184 = vset.pattern.permute.xlu0 %v267_v0  ;;  %v69_v2 = vld [vmem:[#allocation2 + $0x30] sm:$0x1f]  ;;  %v70_v3 = vld [vmem:[#allocation2 + $0x38] sm:$0x1f]  ;;  %v68_v5 = vld [vmem:[#allocation2 + $0x28] sm:$0xff]  ;;  %vm71_vm1 = vcmask 236544  }
   0xe   :  { %55 = vperm.xlu0 %184, %v50_v1   ;;  %169 = vmatpush.msk.msra.mxu2 %vm78_vm0, %v69_v2  ;;  %v65_v6 = vld [vmem:[#allocation2 + $0x10] sm:$0xff]  ;;  %v66_v7 = vld [vmem:[#allocation2 + $0x18] sm:$0xff]  ;;  %v49_v8 = vld [vmem:[%s314_s0] sm:$0xff]  ;;  %v48_v12 = vand.u32 127, %v47_v11  ;;  %v268_v14 = vmov 0.0   ;;  %s269_s0 = smov [#allocation7]  }
   0xf   :  { %173 = vmatpush.msk.msra.mxu3 %vm78_vm0, %v70_v3  ;;  %163 = vmatpush.msk.msra.mxu0 %vm78_vm0, %v69_v2  ;;  %v63_v9 = vld [vmem:[#allocation2] sm:$0xff]  ;;  %v64_v10 = vld [vmem:[#allocation2 + $0x8] sm:$0xff]  ;;  %s145_s26 = sshll.u32 %s269_s0, 4  ;;  %s147_s29 = sshll.u32 %s317_s3, 4  ;;  %s146_s26 = int_to_ptr.vmem [resolvable:$true] %s145_s26  ;;  %s148_s29 = int_to_ptr.hbm [resolvable:$true] %s147_s29 }
  0x10   :  { %170 = vmatpush.msra.mxu2 %v67_v4  ;;  %166 = vmatpush.msk.msra.mxu1 %vm78_vm0, %v70_v3  ;;  %v131_v18 = vld [vmem:[#allocation5] sm:$0xff]  ;;  %v132_v19 = vld [vmem:[#allocation5 + $0x8] sm:$0xff] }
  0x11   :  { %174 = vmatpush.msra.mxu3 %v68_v5  ;;  %98 = vmatpush.msra.mxu0 %v67_v4 }
  0x12   :  { %171 = vmatpush.msra.mxu2 %v65_v6  ;;  %121 = vmatpush.msra.mxu1 %v68_v5 }
  0x13   :  { %175 = vmatpush.msra.mxu3 %v66_v7  ;;  %99 = vmatpush.msra.mxu0 %v65_v6 }
  0x14   :  { %122 = vmatpush.msra.mxu1 %v66_v7  ;;  %172 = vmatpush.msra.mxu2 %v63_v9 }
  0x15   :  { %176 = vmatpush.msra.mxu3 %v64_v10  ;;  %100 = vmatpush.msra.mxu0 %v63_v9 }
  0x16   :  { %52 = vperm.xlu0 %184, %v49_v8   ;;  %123 = vmatpush.msra.mxu1 %v64_v10 }
  0x80   :  { %v56_v13 = vpop.permute.xlu0 %55 }
  0x81   :  { %vm58_vm2 = vcmp.eq.s32.totalorder %v56_v13, %v48_v12 }
  0x82   :  { %v162_v15 = vsel %vm58_vm2, 1.0, %v268_v14 }
  0x83   :  { %165 = vmatmul.msk.f32.vlgmr.msra.gmra.mxu2 %vm71_vm1, %v162_v15  ;;  %168 = vmatmul.msk.f32.vlgmr.msra.gmra.mxu3 %vm71_vm1, %v162_v15 }
  0x88   :  { %v53_v16 = vpop.permute.xlu0 %52 }
  0x89   :  { %vm57_vm3 = vcmp.eq.s32.totalorder %v53_v16, %v48_v12 }
  0x8a   :  { %v161_v17 = vsel %vm57_vm3, 1.0, %v268_v14 }
  0x8b   :  { %164 = vmatmul.msk.f32.vlgmr.msra.gmra.mxu0 %vm71_vm1, %v161_v17  ;;  %167 = vmatmul.msk.f32.vlgmr.msra.gmra.mxu1 %vm71_vm1, %v161_v17 }
 0x106   :  { %v105_v20 = vpop.f32.mrf.mxu2  ;;  %v128_v21 = vpop.f32.mrf.mxu3 }
 0x107   :  { %v137_v22 = vadd.f32 %v131_v18, %v105_v20  ;;  %v138_v23 = vadd.f32 %v132_v19, %v128_v21 }
 0x108   :  { %v102_v24 = vpop.f32.mrf.mxu0  ;;  %v125_v25 = vpop.f32.mrf.mxu1 }
 0x109   :  { %139 = vst [vmem:[#allocation7 + $0x10] sm:$0xff] %v137_v22  ;;  %v133_v26 = vadd.f32 %v131_v18, %v102_v24  ;;  %v134_v27 = vadd.f32 %v132_v19, %v125_v25 }
 0x10a   :  { %140 = vst [vmem:[#allocation7 + $0x18] sm:$0xff] %v138_v23 }
 0x10b   :  { %135 = vst [vmem:[#allocation7] sm:$0xff] %v133_v26 }
 0x10c   :  { %136 = vst [vmem:[#allocation7 + $0x8] sm:$0xff] %v134_v27 }
 0x10d   :  { %153 = dma.vmem_to_hbm [thread:$0]  %s146_s26, 512, %s148_s29, [#allocation4], %s264_s20, %s264_s20, %s265_s21  }
 0x10e   :  { %261 = dma.done.wait [#allocation4], 512  }
 0x10f   :  { %262 = vsyncadd [#allocation4], 4294966784 }
 0x110   :  { %158 = vsyncpa [#allocation3], 1 }
 0x111   :  { %159 = vsyncpa [#allocation6], 1 }
 0x112   :  { %160 = vsyncpa [#allocation4], 1 }

</bundles_post_ra>
